<compile_context>
chip_gen: v7x
topology: tpu7x:2x2x1
jax: 0.10.0
libtpu: 0.0.40
codegen_flags: <defaults>
</compile_context>

<pallas_src>
import math

import jax
import jax.numpy as jnp
from jax.experimental import pallas as pl
from jax.experimental.pallas import tpu as pltpu

B_TILE_MAX = 2048   # max rows per grid step
ROW_ALIGN = 16      # batch/tile row alignment (bf16 sublane tile = 16 rows)
HEAD_LANES = 128    # lane-dense policy-head width (multiple of 128)


def _round_up(n, m):
    return ((n + m - 1) // m) * m


def actor_kernel(x_ref, w1_ref, b1_ref, w2_ref, b2_ref, w3_ref, b3_ref,
                 wp_ref, bp_ref, out_ref):
    # Trunk: three Linear+ReLU layers.  bf16 matmuls on the MXU with f32
    # accumulation; bias-add / ReLU stay in f32 on the VPU.
    x = x_ref[...].astype(jnp.bfloat16)          # no-op when x is already bf16
    h = jnp.dot(x, w1_ref[...], preferred_element_type=jnp.float32)
    h = jnp.maximum(h + b1_ref[...], 0.0)

    h = jnp.dot(h.astype(jnp.bfloat16), w2_ref[...],
                preferred_element_type=jnp.float32)
    h = jnp.maximum(h + b2_ref[...], 0.0)

    h = jnp.dot(h.astype(jnp.bfloat16), w3_ref[...],
                preferred_element_type=jnp.float32)
    h = jnp.maximum(h + b3_ref[...], 0.0)

    # Policy head: N = HEAD_LANES (lane-dense).  Padded columns have zero
    # weights and a -1e9 bias, so exp() underflows to 0 and they contribute
    # nothing to the softmax denominator.
    logits = jnp.dot(h.astype(jnp.bfloat16), wp_ref[...],
                     preferred_element_type=jnp.float32)
    logits = logits + bp_ref[...]
    m = jnp.max(logits, axis=1, keepdims=True)
    e = jnp.exp(logits - m)
    denom = jnp.sum(e, axis=1, keepdims=True)
    # Exact divide: rows sum to 1 at f32 precision (PPO log-prob friendly).
    out_ref[...] = e / denom


def actor_forward(x, params, *, b_tile_max=B_TILE_MAX):
    (w1, b1, w2, b2, w3, b3, wp, bp) = params
    B, state_dim = x.shape
    action_dim = wp.shape[1]

    # Lane-dense policy head: zero-pad weights, -1e9-pad bias.
    head = _round_up(max(action_dim, 1), HEAD_LANES)
    if head != action_dim:
        wp_p = jnp.pad(wp, ((0, 0), (0, head - action_dim)))
        bp_p = jnp.pad(bp, ((0, 0), (0, head - action_dim)),
                       constant_values=-1e9)
    else:
        wp_p, bp_p = wp, bp

    # Batch tiling: pad only to ROW_ALIGN for small batches (single grid
    # step), otherwise split into >= 2 large tiles (<= b_tile_max rows) so
    # both v7x TensorCores stay busy and per-step overhead is amortized.
    B8 = _round_up(B, ROW_ALIGN)
    b_tile = min(b_tile_max, _round_up(pl.cdiv(B8, 2), ROW_ALIGN))
    b_tile = max(b_tile, ROW_ALIGN)
    B_pad = b_tile * pl.cdiv(B8, b_tile)
    if B_pad != B:
        x = jnp.pad(x, ((0, B_pad - B), (0, 0)))

    def const_spec(arr):
        # Whole weight/bias block, same block every grid step -> stays
        # resident in VMEM across the batch loop (never re-DMA'd).
        return pl.BlockSpec(arr.shape, lambda i: (0, 0))

    out = pl.pallas_call(
        actor_kernel,
        out_shape=jax.ShapeDtypeStruct((B_pad, head), jnp.float32),
        grid=(B_pad // b_tile,),
        in_specs=[
            pl.BlockSpec((b_tile, state_dim), lambda i: (i, 0)),
            const_spec(w1), const_spec(b1),
            const_spec(w2), const_spec(b2),
            const_spec(w3), const_spec(b3),
            const_spec(wp_p), const_spec(bp_p),
        ],
        out_specs=pl.BlockSpec((b_tile, head), lambda i: (i, 0)),
        compiler_params=pltpu.CompilerParams(
            dimension_semantics=("parallel",)),
    )(x, w1, b1, w2, b2, w3, b3, wp_p, bp_p)
    return out[:B, :action_dim]


def actor_reference(x, params):
    (w1, b1, w2, b2, w3, b3, wp, bp) = params
    xf = x.astype(jnp.float32)
    h = jnp.maximum(xf @ w1.astype(jnp.float32) + b1, 0.0)
    h = jnp.maximum(h @ w2.astype(jnp.float32) + b2, 0.0)
    h = jnp.maximum(h @ w3.astype(jnp.float32) + b3, 0.0)
    logits = h @ wp.astype(jnp.float32) + bp
    return jax.nn.softmax(logits, axis=1)


def xavier_uniform_relu(key, fan_in, fan_out):
    # torch.nn.init.xavier_uniform_ with gain = calculate_gain('relu') = sqrt(2)
    gain = math.sqrt(2.0)
    bound = gain * math.sqrt(6.0 / (fan_in + fan_out))
    # Stored as [in, out] (transpose of PyTorch's [out, in]); same distribution.
    return jax.random.uniform(key, (fan_in, fan_out), jnp.float32,
                              minval=-bound, maxval=bound)


def init_actor_params(key, state_dim, action_dim):
    k1, k2, k3, k4 = jax.random.split(key, 4)
    dims = [(state_dim, 64), (64, 128), (128, 64), (64, action_dim)]
    keys = [k1, k2, k3, k4]
    params = []
    for (fi, fo), k in zip(dims, keys):
        w = xavier_uniform_relu(k, fi, fo).astype(jnp.bfloat16)  # bf16 weights
        b = jnp.full((1, fo), 0.1, jnp.float32)  # nn.init.constant_(bias, 0.1)
        params.extend([w, b])
    return tuple(params)


if __name__ == "__main__":
    state_dim = 32
    action_dim = 8
    batch = 2

    key = jax.random.PRNGKey(0)
    k_params, k_x = jax.random.split(key)
    params = init_actor_params(k_params, state_dim, action_dim)
    # Rollout states streamed in bf16 (producer-side dtype, not a wrapper cast).
    x = jax.random.normal(k_x, (batch, state_dim), jnp.bfloat16)

    policy = actor_forward(x, params)
    policy = jax.block_until_ready(policy)

    # Sanity: rows are probability distributions and match a pure-JAX reference
    # (tolerance covers bf16 weights/activations).
    ref = actor_reference(x, params)
    row_sums = jnp.sum(policy, axis=1)
    assert policy.shape == (batch, action_dim)
    assert bool(jnp.all(jnp.abs(row_sums - 1.0) < 1e-3))
    assert bool(jnp.all(policy >= 0.0))
    assert bool(jnp.all(jnp.abs(policy - ref) < 2e-2))

    print("KERNEL_OK")
</pallas_src>

<mosaic_0001>
module attributes {stable_mosaic.version = 11 : i64} {
  func.func @actor_kernel(%arg0: i32, %arg1: memref<16x32xbf16, #tpu.memory_space<vmem>>, %arg2: memref<32x64xbf16, #tpu.memory_space<vmem>>, %arg3: memref<1x64xf32, #tpu.memory_space<vmem>>, %arg4: memref<64x128xbf16, #tpu.memory_space<vmem>>, %arg5: memref<1x128xf32, #tpu.memory_space<vmem>>, %arg6: memref<128x64xbf16, #tpu.memory_space<vmem>>, %arg7: memref<1x64xf32, #tpu.memory_space<vmem>>, %arg8: memref<64x128xbf16, #tpu.memory_space<vmem>>, %arg9: memref<1x128xf32, #tpu.memory_space<vmem>>, %arg10: memref<16x128xf32, #tpu.memory_space<vmem>>) attributes {dimension_semantics = [#tpu.dimension_semantics<parallel>], iteration_bounds = array<i64: 1>, scalar_prefetch = 0 : i64, scratch_operands = 0 : i64, tpu.core_type = #tpu.core_type<tc>, window_params = [{transform_indices = @transform_0, window_bounds = array<i64: 16, 32>}, {pipeline_mode = #tpu.pipeline_mode<synchronous>, transform_indices = @transform_1, window_bounds = array<i64: 32, 64>}, {pipeline_mode = #tpu.pipeline_mode<synchronous>, transform_indices = @transform_2, window_bounds = array<i64: 1, 64>}, {pipeline_mode = #tpu.pipeline_mode<synchronous>, transform_indices = @transform_3, window_bounds = array<i64: 64, 128>}, {pipeline_mode = #tpu.pipeline_mode<synchronous>, transform_indices = @transform_4, window_bounds = array<i64: 1, 128>}, {pipeline_mode = #tpu.pipeline_mode<synchronous>, transform_indices = @transform_5, window_bounds = array<i64: 128, 64>}, {pipeline_mode = #tpu.pipeline_mode<synchronous>, transform_indices = @transform_6, window_bounds = array<i64: 1, 64>}, {pipeline_mode = #tpu.pipeline_mode<synchronous>, transform_indices = @transform_7, window_bounds = array<i64: 64, 128>}, {pipeline_mode = #tpu.pipeline_mode<synchronous>, transform_indices = @transform_8, window_bounds = array<i64: 1, 128>}, {transform_indices = @transform_9, window_bounds = array<i64: 16, 128>}]} {
    %c0 = arith.constant 0 : index
    %c0_0 = arith.constant 0 : index
    %0 = vector.load %arg1[%c0, %c0_0] : memref<16x32xbf16, #tpu.memory_space<vmem>>, vector<16x32xbf16>
    %c0_1 = arith.constant 0 : index
    %c0_2 = arith.constant 0 : index
    %1 = vector.load %arg2[%c0_1, %c0_2] : memref<32x64xbf16, #tpu.memory_space<vmem>>, vector<32x64xbf16>
    %cst = arith.constant dense<0.000000e+00> : vector<16x64xf32>
    %2 = tpu.matmul %0, %1, %cst {dimension_numbers = #tpu.dot_dimension_numbers<[1], [0], [0], [1], [0, 0, 1, 1], [], []>} : vector<16x32xbf16>, vector<32x64xbf16>, vector<16x64xf32> -> vector<16x64xf32>
    %c0_3 = arith.constant 0 : index
    %c0_4 = arith.constant 0 : index
    %3 = vector.load %arg3[%c0_3, %c0_4] : memref<1x64xf32, #tpu.memory_space<vmem>>, vector<1x64xf32>
    %4 = vector.broadcast %3 : vector<1x64xf32> to vector<16x64xf32>
    %5 = arith.addf %2, %4 : vector<16x64xf32>
    %cst_5 = arith.constant 0.000000e+00 : f32
    %6 = vector.broadcast %cst_5 : f32 to vector<16x64xf32>
    %7 = arith.maximumf %5, %6 : vector<16x64xf32>
    %8 = arith.truncf %7 : vector<16x64xf32> to vector<16x64xbf16>
    %c0_6 = arith.constant 0 : index
    %c0_7 = arith.constant 0 : index
    %9 = vector.load %arg4[%c0_6, %c0_7] : memref<64x128xbf16, #tpu.memory_space<vmem>>, vector<64x128xbf16>
    %cst_8 = arith.constant dense<0.000000e+00> : vector<16x128xf32>
    %10 = tpu.matmul %8, %9, %cst_8 {dimension_numbers = #tpu.dot_dimension_numbers<[1], [0], [0], [1], [0, 0, 1, 1], [], []>} : vector<16x64xbf16>, vector<64x128xbf16>, vector<16x128xf32> -> vector<16x128xf32>
    %c0_9 = arith.constant 0 : index
    %c0_10 = arith.constant 0 : index
    %11 = vector.load %arg5[%c0_9, %c0_10] : memref<1x128xf32, #tpu.memory_space<vmem>>, vector<1x128xf32>
    %12 = vector.broadcast %11 : vector<1x128xf32> to vector<16x128xf32>
    %13 = arith.addf %10, %12 : vector<16x128xf32>
    %cst_11 = arith.constant 0.000000e+00 : f32
    %14 = vector.broadcast %cst_11 : f32 to vector<16x128xf32>
    %15 = arith.maximumf %13, %14 : vector<16x128xf32>
    %16 = arith.truncf %15 : vector<16x128xf32> to vector<16x128xbf16>
    %c0_12 = arith.constant 0 : index
    %c0_13 = arith.constant 0 : index
    %17 = vector.load %arg6[%c0_12, %c0_13] : memref<128x64xbf16, #tpu.memory_space<vmem>>, vector<128x64xbf16>
    %cst_14 = arith.constant dense<0.000000e+00> : vector<16x64xf32>
    %18 = tpu.matmul %16, %17, %cst_14 {dimension_numbers = #tpu.dot_dimension_numbers<[1], [0], [0], [1], [0, 0, 1, 1], [], []>} : vector<16x128xbf16>, vector<128x64xbf16>, vector<16x64xf32> -> vector<16x64xf32>
    %c0_15 = arith.constant 0 : index
    %c0_16 = arith.constant 0 : index
    %19 = vector.load %arg7[%c0_15, %c0_16] : memref<1x64xf32, #tpu.memory_space<vmem>>, vector<1x64xf32>
    %20 = vector.broadcast %19 : vector<1x64xf32> to vector<16x64xf32>
    %21 = arith.addf %18, %20 : vector<16x64xf32>
    %cst_17 = arith.constant 0.000000e+00 : f32
    %22 = vector.broadcast %cst_17 : f32 to vector<16x64xf32>
    %23 = arith.maximumf %21, %22 : vector<16x64xf32>
    %24 = arith.truncf %23 : vector<16x64xf32> to vector<16x64xbf16>
    %c0_18 = arith.constant 0 : index
    %c0_19 = arith.constant 0 : index
    %25 = vector.load %arg8[%c0_18, %c0_19] : memref<64x128xbf16, #tpu.memory_space<vmem>>, vector<64x128xbf16>
    %cst_20 = arith.constant dense<0.000000e+00> : vector<16x128xf32>
    %26 = tpu.matmul %24, %25, %cst_20 {dimension_numbers = #tpu.dot_dimension_numbers<[1], [0], [0], [1], [0, 0, 1, 1], [], []>} : vector<16x64xbf16>, vector<64x128xbf16>, vector<16x128xf32> -> vector<16x128xf32>
    %c0_21 = arith.constant 0 : index
    %c0_22 = arith.constant 0 : index
    %27 = vector.load %arg9[%c0_21, %c0_22] : memref<1x128xf32, #tpu.memory_space<vmem>>, vector<1x128xf32>
    %28 = vector.broadcast %27 : vector<1x128xf32> to vector<16x128xf32>
    %29 = arith.addf %26, %28 : vector<16x128xf32>
    %cst_23 = arith.constant dense<0xFF800000> : vector<16xf32>
    %30 = vector.multi_reduction <maximumf>, %29, %cst_23 [1] : vector<16x128xf32> to vector<16xf32>
    %31 = vector.shape_cast %30 : vector<16xf32> to vector<16x1xf32>
    %32 = vector.broadcast %31 : vector<16x1xf32> to vector<16x128xf32>
    %33 = arith.subf %29, %32 : vector<16x128xf32>
    %34 = math.exp %33 : vector<16x128xf32>
    %cst_24 = arith.constant dense<0.000000e+00> : vector<16xf32>
    %35 = vector.multi_reduction <add>, %34, %cst_24 [1] : vector<16x128xf32> to vector<16xf32>
    %36 = vector.shape_cast %35 : vector<16xf32> to vector<16x1xf32>
    %37 = vector.broadcast %36 : vector<16x1xf32> to vector<16x128xf32>
    %38 = arith.divf %34, %37 : vector<16x128xf32>
    %c0_25 = arith.constant 0 : index
    %c0_26 = arith.constant 0 : index
    %39 = vector.load %arg10[%c0_25, %c0_26] : memref<16x128xf32, #tpu.memory_space<vmem>>, vector<16x128xf32>
    tpu.vector_store %arg10[%c0_25, %c0_26], %38 {strides = array<i32>} : memref<16x128xf32, #tpu.memory_space<vmem>>, vector<16x128xf32>,
    return
  }
  func.func @transform_0(%arg0: i32) -> (i32, i32) {
    %c0_i32 = arith.constant 0 : i32
    %c0_i32_0 = arith.constant 0 : i32
    return %arg0, %c0_i32 : i32, i32
  }
  func.func @transform_1(%arg0: i32) -> (i32, i32) {
    %c0_i32 = arith.constant 0 : i32
    %c0_i32_0 = arith.constant 0 : i32
    %c0_i32_1 = arith.constant 0 : i32
    return %c0_i32, %c0_i32_0 : i32, i32
  }
  func.func @transform_2(%arg0: i32) -> (i32, i32) {
    %c0_i32 = arith.constant 0 : i32
    %c0_i32_0 = arith.constant 0 : i32
    %c0_i32_1 = arith.constant 0 : i32
    return %c0_i32, %c0_i32_0 : i32, i32
  }
  func.func @transform_3(%arg0: i32) -> (i32, i32) {
    %c0_i32 = arith.constant 0 : i32
    %c0_i32_0 = arith.constant 0 : i32
    %c0_i32_1 = arith.constant 0 : i32
    return %c0_i32, %c0_i32_0 : i32, i32
  }
  func.func @transform_4(%arg0: i32) -> (i32, i32) {
    %c0_i32 = arith.constant 0 : i32
    %c0_i32_0 = arith.constant 0 : i32
    %c0_i32_1 = arith.constant 0 : i32
    return %c0_i32, %c0_i32_0 : i32, i32
  }
  func.func @transform_5(%arg0: i32) -> (i32, i32) {
    %c0_i32 = arith.constant 0 : i32
    %c0_i32_0 = arith.constant 0 : i32
    %c0_i32_1 = arith.constant 0 : i32
    return %c0_i32, %c0_i32_0 : i32, i32
  }
  func.func @transform_6(%arg0: i32) -> (i32, i32) {
    %c0_i32 = arith.constant 0 : i32
    %c0_i32_0 = arith.constant 0 : i32
    %c0_i32_1 = arith.constant 0 : i32
    return %c0_i32, %c0_i32_0 : i32, i32
  }
  func.func @transform_7(%arg0: i32) -> (i32, i32) {
    %c0_i32 = arith.constant 0 : i32
    %c0_i32_0 = arith.constant 0 : i32
    %c0_i32_1 = arith.constant 0 : i32
    return %c0_i32, %c0_i32_0 : i32, i32
  }
  func.func @transform_8(%arg0: i32) -> (i32, i32) {
    %c0_i32 = arith.constant 0 : i32
    %c0_i32_0 = arith.constant 0 : i32
    %c0_i32_1 = arith.constant 0 : i32
    return %c0_i32, %c0_i32_0 : i32, i32
  }
  func.func @transform_9(%arg0: i32) -> (i32, i32) {
    %c0_i32 = arith.constant 0 : i32
    %c0_i32_0 = arith.constant 0 : i32
    return %arg0, %c0_i32 : i32, i32
  }
}

</mosaic_0001>

<bundles_post_ra>
// kernel: tpu_custom_call.1
= control target key start
LH: loop header
LB: loop body
LE: loop exit
PB: predicated region body
PF: predicated region fallthrough
CT: control target
= control target key end

     0   :  { %v589_v1 = vmov 0.0   ;;  %vm590_vm0 = vmmov 0   ;;  %vm64_vm1 = vcmask 261120   ;;  %s753_s0 = inlined_call_operand.vmem [shape: bf16[16,32], index: 0, kind: input, shape index: {}]   ;;  %s754_s1 = inlined_call_operand.vmem [shape: bf16[32,64], index: 1, kind: input, shape index: {}]   ;;  %s755_s2 = inlined_call_operand.vmem [shape: f32[1,64], index: 2, kind: input, shape index: {}]   ;;  %s756_s3 = inlined_call_operand.vmem [shape: bf16[64,128], index: 3, kind: input, shape index: {}]   ;;  %s757_s4 = inlined_call_operand.vmem [shape: f32[1,128], index: 4, kind: input, shape index: {}]   ;;  %s758_s5 = inlined_call_operand.vmem [shape: bf16[128,64], index: 5, kind: input, shape index: {}]   ;;  %s759_s6 = inlined_call_operand.vmem [shape: f32[1,64], index: 6, kind: input, shape index: {}]   ;;  %s760_s7 = inlined_call_operand.vmem [shape: bf16[64,128], index: 7, kind: input, shape index: {}]   ;;  %s761_s8 = inlined_call_operand.vmem [shape: f32[1,128], index: 8, kind: input, shape index: {}]   ;;  %s762_s9 = inlined_call_operand.hbm [shape: f32[16,128], index: 9, kind: output, shape index: {}]  }
   0x1   :  { %v538_v0 = vld [vmem:[%s754_s1] sm:$0xff]   ;;  %481 = vmatprep.subr.bf16.mxu0 %v589_v1  ;;  %489 = vmatprep.subr.bf16.mxu1 %v589_v1  ;;  %v539_v2 = vld [vmem:[%s754_s1 + $0x8] sm:$0xff]  }
   0x2   :  { %482 = vmatpush3.bf16.msra.mxu0 %v538_v0  ;;  %485 = vmatprep.mubr.msk.bf16.mxu0 %vm590_vm0, %v589_v1  ;;  %v541_v3 = vld [vmem:[%s756_s3] sm:$0xff]   ;;  %v542_v5 = vld [vmem:[%s756_s3 + $0x8] sm:$0xff]  }
   0x3   :  { %483 = vmatprep.subr.bf16.mxu0 %v589_v1  ;;  %497 = vmatprep.mubr.msk.bf16.mxu1 %vm590_vm0, %v589_v1  ;;  %v540_v4 = vld [vmem:[%s753_s0] sm:$0xff]  }
   0x4   :  { %490 = vmatpush3.bf16.msra.mxu1 %v541_v3 }
   0x5   :  { %491 = vmatprep.subr.bf16.mxu1 %v589_v1 }
   0x6   :  { %484 = vmatpush3.bf16.msra.mxu0 %v539_v2 }
   0x7   :  { %501 = vmatprep.subr.bf16.mxu0 %v589_v1 }
   0x8   :  { %492 = vmatpush3.bf16.msra.mxu1 %v542_v5 }
   0x9   :  { %486 = vmatmul.mubr.msk.bf16.vlgmr.msra.gmra.mrb[0].mxu0 %vm64_vm1, %v540_v4  ;;  %493 = vmatprep.subr.bf16.mxu1 %v589_v1 }
   0xa   :  { %517 = vmatprep.mubr.msk.bf16.mxu0 %vm590_vm0, %v589_v1 }
   0xb   :  { %14 = vsyncpa [#allocation3], 0  ;;  %v543_v6 = vld [vmem:[%s756_s3 + $0x10] sm:$0xff]   ;;  %v544_v7 = vld [vmem:[%s756_s3 + $0x18] sm:$0xff]   ;;  %vm151_vm2 = vcmask 523264  }
   0xc   :  { %494 = vmatpush3.bf16.msra.mxu1 %v543_v6  ;;  %v545_v8 = vld [vmem:[%s758_s5] sm:$0xff]   ;;  %v546_v9 = vld [vmem:[%s758_s5 + $0x8] sm:$0xff]   ;;  %v547_v10 = vld [vmem:[%s758_s5 + $0x10] sm:$0xff]  }
   0xd   :  { %495 = vmatprep.subr.bf16.mxu1 %v589_v1  ;;  %502 = vmatpush3.bf16.msra.mxu0 %v545_v8  ;;  %v548_v11 = vld [vmem:[%s758_s5 + $0x18] sm:$0xff]   ;;  %v549_v12 = vld [vmem:[%s758_s5 + $0x20] sm:$0xff]   ;;  %v550_v13 = vld [vmem:[%s758_s5 + $0x28] sm:$0xff]  }
   0xe   :  { %503 = vmatprep.subr.bf16.mxu0 %v589_v1  ;;  %v433_v14 = vld [vmem:[%s755_s2] ss:$0 sm:$0xff]  ;;  %v551_v24 = vld [vmem:[%s758_s5 + $0x30] sm:$0xff]   ;;  %v552_v25 = vld [vmem:[%s758_s5 + $0x38] sm:$0xff]  }
   0xf   :  { %v553_v26 = vld [vmem:[%s760_s7] sm:$0xff]   ;;  %v554_v27 = vld [vmem:[%s760_s7 + $0x8] sm:$0xff]   ;;  %v555_v38 = vld [vmem:[%s760_s7 + $0x10] sm:$0xff]  }
  0x10   :  { %496 = vmatpush3.bf16.msra.mxu1 %v544_v7  ;;  %v438_v28 = vld [vmem:[%s757_s4] ss:$0 sm:$0xff]  ;;  %v556_v39 = vld [vmem:[%s760_s7 + $0x18] sm:$0xff]  }
  0x11   :  { %521 = vmatprep.subr.bf16.mxu1 %v589_v1  ;;  %504 = vmatpush3.bf16.msra.mxu0 %v546_v9  ;;  %v444_v40 = vld [vmem:[%s759_s6] ss:$0 sm:$0xff]  ;;  %s591_s6 = smov [#allocation2]  }
  0x12   :  { %505 = vmatprep.subr.bf16.mxu0 %v589_v1  ;;  %v453_v50 = vld [vmem:[%s761_s8] ss:$0 sm:$0xff]  ;;  %s422_s7 = sshll.u32 %s591_s6, 4  ;;  %s423_s7 = int_to_ptr.vmem [resolvable:$true] %s422_s7 }
  0x13   :  { %s565_s8 = scalar_lea.vmem %s423_s7, 256  ;;  %p570_p1 = scmp.lt.s32.totalorder %s423_s7, %s423_s7 }
  0x14   :  { %p566_p0 = scmp.ne.s32.totalorder %s423_s7, %s565_s8  ;;  %p571_p2 = scmp.lt.s32.totalorder %s565_s8, %s565_s8 }
  0x15   :  { %506 = vmatpush3.bf16.msra.mxu0 %v547_v10 }
  0x16   :  { %507 = vmatprep.subr.bf16.mxu0 %v589_v1  ;;  %p572_p3 = por %p571_p2, %p570_p1 }
  0x18   :  { %p573_p4 = pnand %p572_p3, %p566_p0 }
  0x19   :  { %508 = vmatpush3.bf16.msra.mxu0 %v548_v11 }
  0x1a   :  { %509 = vmatprep.subr.bf16.mxu0 %v589_v1 }
  0x1d   :  { %510 = vmatpush3.bf16.msra.mxu0 %v549_v12 }
  0x1e   :  { %511 = vmatprep.subr.bf16.mxu0 %v589_v1 }
  0x21   :  { %512 = vmatpush3.bf16.msra.mxu0 %v550_v13 }
  0x22   :  { %513 = vmatprep.subr.bf16.mxu0 %v589_v1 }
  0x25   :  { %514 = vmatpush3.bf16.msra.mxu0 %v551_v24 }
  0x26   :  { %515 = vmatprep.subr.bf16.mxu0 %v589_v1 }
  0x29   :  { %516 = vmatpush3.bf16.msra.mxu0 %v552_v25 }
  0xdc   :  { %v102_v15 = vpop.f32.mrb[0].mxu0 }
  0xdd   :  { %v103_v16 = vadd.f32 %v433_v14, %v102_v15  ;;  %v487_v17 = vpop.f32.mrb[1].mxu0 }
  0xde   :  { %v105_v18 = vpop.f32.mrb[2].mxu0 }
  0xdf   :  { %v106_v19 = vadd.f32 %v433_v14, %v105_v18  ;;  %v488_v20 = vpop.f32.mrb[3].mxu0  ;;  %v109_v21 = vmax.f32 %v103_v16, 0.0 }
  0xe1   :  { %v110_v22 = vmax.f32 %v106_v19, 0.0 }
  0xe3   :  { %v111_v23 = vpack.c.bf16 %v110_v22, %v109_v21 }
  0xe5   :  { %498 = vmatmul.mubr.msk.bf16.vlgmr.msra.gmra.mrb[0].mxu1 %vm151_vm2, %v111_v23 }
  0xe6   :  { %529 = vmatprep.mubr.msk.bf16.mxu1 %vm590_vm0, %v589_v1  ;;  %522 = vmatpush3.bf16.msra.mxu1 %v553_v26 }
  0xe7   :  { %523 = vmatprep.subr.bf16.mxu1 %v589_v1 }
  0xea   :  { %524 = vmatpush3.bf16.msra.mxu1 %v554_v27 }
  0xeb   :  { %525 = vmatprep.subr.bf16.mxu1 %v589_v1 }
  0xee   :  { %526 = vmatpush3.bf16.msra.mxu1 %v555_v38 }
  0xef   :  { %527 = vmatprep.subr.bf16.mxu1 %v589_v1 }
  0xf2   :  { %528 = vmatpush3.bf16.msra.mxu1 %v556_v39 }
 0x1b8   :  { %v189_v29 = vpop.f32.mrb[0].mxu1 }
 0x1b9   :  { %v190_v30 = vadd.f32 %v438_v28, %v189_v29  ;;  %v499_v31 = vpop.f32.mrb[1].mxu1 }
 0x1ba   :  { %v192_v32 = vpop.f32.mrb[2].mxu1 }
 0x1bb   :  { %v193_v33 = vadd.f32 %v438_v28, %v192_v32  ;;  %v500_v34 = vpop.f32.mrb[3].mxu1  ;;  %v196_v35 = vmax.f32 %v190_v30, 0.0 }
 0x1bd   :  { %v197_v36 = vmax.f32 %v193_v33, 0.0 }
 0x1bf   :  { %v198_v37 = vpack.c.bf16 %v197_v36, %v196_v35 }
 0x1c1   :  { %518 = vmatmul.mubr.bf16.vlgmr.msra.gmra.mrb[4].mxu0 %v198_v37 }
 0x294   :  { %v304_v41 = vpop.f32.mrb[4].mxu0 }
 0x295   :  { %v305_v42 = vadd.f32 %v444_v40, %v304_v41  ;;  %v519_v43 = vpop.f32.mrb[5].mxu0 }
 0x296   :  { %v307_v44 = vpop.f32.mrb[6].mxu0 }
 0x297   :  { %v308_v45 = vadd.f32 %v444_v40, %v307_v44  ;;  %v520_v46 = vpop.f32.mrb[7].mxu0  ;;  %v311_v47 = vmax.f32 %v305_v42, 0.0 }
 0x299   :  { %v312_v48 = vmax.f32 %v308_v45, 0.0 }
 0x29b   :  { %v313_v49 = vpack.c.bf16 %v312_v48, %v311_v47 }
 0x29d   :  { %530 = vmatmul.mubr.msk.bf16.vlgmr.msra.gmra.mrb[4].mxu1 %vm151_vm2, %v313_v49 }
 0x370   :  { %v390_v51 = vpop.f32.mrb[4].mxu1 }
 0x371   :  { %v391_v52 = vadd.f32 %v453_v50, %v390_v51  ;;  %v531_v53 = vpop.f32.mrb[5].mxu1 }
 0x372   :  { %v393_v54 = vpop.f32.mrb[6].mxu1 }
 0x373   :  { %397 = vmax.xlane.f32.xlu0 %v391_v52  ;;  %v532_v55 = vpop.f32.mrb[7].mxu1  ;;  %v394_v56 = vadd.f32 %v453_v50, %v393_v54 }
 0x377   :  { %399 = vmax.xlane.f32.xlu0 %v394_v56 }
 0x400   :  { %v398_v57 = vpop.xlane.xlu0 %397 }
 0x401   :  { %v401_v58 = vsub.f32 %v391_v52, %v398_v57 }
 0x403   :  { %v403_v59 = vmul.f32 1.442695, %v401_v58 }
 0x404   :  { %v400_v60 = vpop.xlane.xlu0 %399 }
 0x405   :  { %557 = vpow2.f32 %v403_v59  ;;  %v402_v61 = vsub.f32 %v394_v56, %v400_v60 }
 0x407   :  { %v405_v62 = vmul.f32 1.442695, %v402_v61 }
 0x409   :  { %559 = vpow2.f32 %v405_v62 }
 0x40f   :  { %v558_v63 = vpop.eup %557 }
 0x410   :  { %407 = vadd.xlane.f32.xlu1 %v558_v63 }
 0x413   :  { %v560_v0 = vpop.eup %559 }
 0x414   :  { %409 = vadd.xlane.f32.xlu1 %v560_v0 }
 0x49d   :  { %v408_v1 = vpop.xlane.xlu1 %407 }
 0x49e   :  { %561 = vrcp.f32 %v408_v1 }
 0x4a1   :  { %v410_v2 = vpop.xlane.xlu1 %409 }
 0x4a2   :  { %563 = vrcp.f32 %v410_v2 }
 0x4a8   :  { %v562_v3 = vpop.eup %561 }
 0x4a9   :  { %v412_v4 = vmul.f32 %v562_v3, %v558_v63 }
 0x4ab   :  { %415 = vst [vmem:[#allocation2] sm:$0xff] %v412_v4 }
 0x4ac   :  { %v564_v5 = vpop.eup %563 }
 0x4ad   :  { %v414_v6 = vmul.f32 %v564_v5, %v560_v0 }
 0x4af   :  { %416 = vst [vmem:[#allocation2 + $0x8] sm:$0xff] %v414_v6 }
 0x4b0   :  { %576 = shalt.err (!%p573_p4)
}
 0x4b1   :  { %s577_s27 = scalar_lea.hbm %s762_s9, 256 }
 0x4b2   :  { %p578_p5 = scmp.ne.s32.totalorder %s762_s9, %s577_s27  ;;  %p581_p6 = scmp.lt.u32.totalorder %s577_s27, %s762_s9 }
 0x4b4   :  { %p583_p7 = pnand %p581_p6, %p578_p5 }
 0x4b6   :  { %586 = shalt.err (!%p583_p7)
}
 0x4b7   :  { %s592_s11 = smov 128   ;;  %s593_s12 = smov 8  }
 0x4b8   :  { %428 = dma.vmem_to_hbm [thread:$0]  %s423_s7, 256, %s762_s9, [#allocation3], %s592_s11, %s592_s11, %s593_s12  }
 0x4b9   :  { %587 = dma.done.wait [#allocation3], 256  }
 0x4ba   :  { %588 = vsyncadd [#allocation3], 4294967040 }
 0x4bb   :  { %432 = vsyncpa [#allocation3], 1 }

</bundles_post_ra>
